<compile_context>
chip_gen: v6e
topology: v6e:2x2x1
jax: 0.10.0
libtpu: 0.0.40
codegen_flags: <defaults>
</compile_context>

<pallas_src>
import numpy as np
import jax
import jax.numpy as jnp
from jax.experimental import pallas as pl
from jax.experimental.pallas import tpu as pltpu

ALPHA = 0.5        # args.alpha
EOS_COEF = 0.1     # eos_coef

_SMEM = pltpu.MemorySpace.SMEM
_N_OUT = 11        # number of scalar reductions emitted by the fused kernel


def _round_up(x, m):
    return ((x + m - 1) // m) * m


# ----------------------------------------------------------------------------
# Fused loss kernel.
#   grid axis 0: tiles of the B*Q row axis (focal + weighted CE accumulate).
#   program_id(0) == 0: init accumulators + box/GIoU + rec loss (tiny, once).
# Outputs (SMEM, f32[11]):
#   0 pos_loss_sum   1 neg_loss_sum   2 num_pos
#   3 sum(w*nll)     4 sum(w)
#   5 l1_sub_sum     6 l1_obj_sum     7 exist_sum
#   8 sub_giou_sum   9 obj_giou_sum   10 rec_mean
# ----------------------------------------------------------------------------
def _fused_loss_kernel(hoi_logit_ref, hoi_gt_ref, obj_logit_ref, obj_tgt_ref,
                       w_ref, box_ref, feat_a_ref, feat_b_ref, out_ref):
    pid = pl.program_id(0)

    @pl.when(pid == 0)
    def _first_step():
        # init row-tiled accumulators
        out_ref[0] = 0.0
        out_ref[1] = 0.0
        out_ref[2] = 0.0
        out_ref[3] = 0.0
        out_ref[4] = 0.0

        # ---- matched box losses (L1 + GIoU), padded rows masked out -------
        box = box_ref[...]                         # (N_pad, 17)
        ss, so = box[:, 0:4], box[:, 4:8]          # src sub / obj (cxcywh)
        ts, to = box[:, 8:12], box[:, 12:16]       # tgt sub / obj
        valid = box[:, 16:17]                      # 1.0 for real matched rows
        exist = (jnp.sum((to != 0.0).astype(jnp.float32), axis=-1, keepdims=True)
                 > 0.0).astype(jnp.float32)        # any(tgt_obj != 0)

        out_ref[5] = jnp.sum(jnp.abs(ss - ts) * valid)
        out_ref[6] = jnp.sum(jnp.abs(so - to) * exist)
        out_ref[7] = jnp.sum(exist)

        def giou(a, b):
            ax0 = a[:, 0:1] - 0.5 * a[:, 2:3]
            ay0 = a[:, 1:2] - 0.5 * a[:, 3:4]
            ax1 = a[:, 0:1] + 0.5 * a[:, 2:3]
            ay1 = a[:, 1:2] + 0.5 * a[:, 3:4]
            bx0 = b[:, 0:1] - 0.5 * b[:, 2:3]
            by0 = b[:, 1:2] - 0.5 * b[:, 3:4]
            bx1 = b[:, 0:1] + 0.5 * b[:, 2:3]
            by1 = b[:, 1:2] + 0.5 * b[:, 3:4]
            area_a = (ax1 - ax0) * (ay1 - ay0)
            area_b = (bx1 - bx0) * (by1 - by0)
            iw = jnp.maximum(jnp.minimum(ax1, bx1) - jnp.maximum(ax0, bx0), 0.0)
            ih = jnp.maximum(jnp.minimum(ay1, by1) - jnp.maximum(ay0, by0), 0.0)
            inter = iw * ih
            union = area_a + area_b - inter
            # guard 0/0 on all-zero padded rows (forward identical for real rows)
            union_safe = jnp.where(union > 0.0, union, 1.0)
            iou = inter / union_safe
            ew = jnp.maximum(jnp.maximum(ax1, bx1) - jnp.minimum(ax0, bx0), 0.0)
            eh = jnp.maximum(jnp.maximum(ay1, by1) - jnp.minimum(ay0, by0), 0.0)
            enc = ew * eh
            enc_safe = jnp.where(enc > 0.0, enc, 1.0)
            return iou - (enc - union) / enc_safe

        out_ref[8] = jnp.sum((1.0 - giou(ss, ts)) * valid)
        out_ref[9] = jnp.sum((1.0 - giou(so, to)) * exist)

        # ---- reconstruction loss: mean L1 between feature maps ------------
        out_ref[10] = jnp.mean(jnp.abs(feat_a_ref[...].astype(jnp.float32)
                                       - feat_b_ref[...].astype(jnp.float32)))

    # ---- modified focal loss (_neg_loss on clamped sigmoid), row tile ------
    logits = hoi_logit_ref[...].astype(jnp.float32)      # (T, C_hoi_pad)
    gt = hoi_gt_ref[...].astype(jnp.float32)              # padded with 2.0
    p = jnp.clip(jax.nn.sigmoid(logits), 0.0001, 1.0 - 0.0001)
    pos = (gt == 1.0).astype(jnp.float32)
    neg = (gt < 1.0).astype(jnp.float32)                   # excludes pads (=2)
    out_ref[0] += jnp.sum(ALPHA * jnp.log(p) * jnp.square(1.0 - p) * pos)
    out_ref[1] += jnp.sum((1.0 - ALPHA) * jnp.log(1.0 - p) * jnp.square(p) * neg)
    out_ref[2] += jnp.sum(pos)

    # ---- class-weighted cross entropy, row tile -----------------------------
    ol = obj_logit_ref[...].astype(jnp.float32)            # (T, C_obj_pad)
    tgt = obj_tgt_ref[...]                                 # (T, 1) int32, -1 on pads
    w = w_ref[...]                                         # (1, C_obj_pad)
    t_rows, c = ol.shape
    cls = jax.lax.broadcasted_iota(jnp.int32, (t_rows, c), 1)
    onehot = (cls == tgt).astype(jnp.float32)              # all-zero for padded rows
    m = jnp.max(ol, axis=-1, keepdims=True)
    lse = m + jnp.log(jnp.sum(jnp.exp(ol - m), axis=-1, keepdims=True))
    picked = jnp.sum(onehot * ol, axis=-1, keepdims=True)
    wi = jnp.sum(onehot * w, axis=-1, keepdims=True)
    out_ref[3] += jnp.sum(wi * (lse - picked))
    out_ref[4] += jnp.sum(wi)


def _run_fused_kernel(hoi_logits, hoi_gt, obj_logits, obj_tgt, weight_row,
                      box_pack, feat_a, feat_b, row_tile):
    r_pad, c_hoi_pad = hoi_logits.shape
    _, c_obj_pad = obj_logits.shape
    n_pad = box_pack.shape[0]
    b, d = feat_a.shape
    grid = r_pad // row_tile

    bytes_accessed = int(hoi_logits.size * hoi_logits.dtype.itemsize
                         + hoi_gt.size * hoi_gt.dtype.itemsize
                         + obj_logits.size * 4 + obj_tgt.size * 4
                         + weight_row.size * 4 + box_pack.size * 4
                         + feat_a.size * 4 + feat_b.size * 4 + _N_OUT * 4)
    flops = int(r_pad * (c_hoi_pad * 10 + c_obj_pad * 8) + n_pad * 80 + b * d * 3)
    transcendentals = int(r_pad * (c_hoi_pad * 3 + c_obj_pad * 2))

    return pl.pallas_call(
        _fused_loss_kernel,
        out_shape=jax.ShapeDtypeStruct((_N_OUT,), jnp.float32),
        grid_spec=pltpu.PrefetchScalarGridSpec(
            num_scalar_prefetch=0,
            grid=(grid,),
            in_specs=[
                pl.BlockSpec((row_tile, c_hoi_pad), lambda i: (i, 0)),
                pl.BlockSpec((row_tile, c_hoi_pad), lambda i: (i, 0)),
                pl.BlockSpec((row_tile, c_obj_pad), lambda i: (i, 0)),
                pl.BlockSpec((row_tile, 1), lambda i: (i, 0)),
                pl.BlockSpec((1, c_obj_pad), lambda i: (0, 0)),
                pl.BlockSpec((n_pad, 17), lambda i: (0, 0)),
                pl.BlockSpec((b, d), lambda i: (0, 0)),
                pl.BlockSpec((b, d), lambda i: (0, 0)),
            ],
            out_specs=pl.BlockSpec((_N_OUT,), lambda i: (0,), memory_space=_SMEM),
        ),
        compiler_params=pltpu.CompilerParams(
            dimension_semantics=("arbitrary",)),
        cost_estimate=pl.CostEstimate(
            flops=flops, transcendentals=transcendentals,
            bytes_accessed=bytes_accessed),
    )(hoi_logits, hoi_gt, obj_logits, obj_tgt, weight_row, box_pack, feat_a, feat_b)


# ----------------------------------------------------------------------------
# Criterion forward (hoi branch: hoi_labels, obj_labels, sub_obj_boxes, rec_loss)
# ----------------------------------------------------------------------------
def set_criterion_hoi_forward(outputs, targets, indices, num_obj_classes):
    pred_obj_logits = jnp.asarray(outputs['pred_obj_logits'])
    pred_hoi_logits = jnp.asarray(outputs['pred_hoi_logits'])
    pred_sub_boxes = jnp.asarray(outputs['pred_sub_boxes'], jnp.float32)
    pred_obj_boxes = jnp.asarray(outputs['pred_obj_boxes'], jnp.float32)
    clip_feat = jnp.asarray(outputs['clip_cls_feature'], jnp.float32)
    hoi_feat = jnp.asarray(outputs['hoi_feature'], jnp.float32)

    B, Q, C_obj = pred_obj_logits.shape          # C_obj = num_obj_classes + 1
    num_hoi = pred_hoi_logits.shape[-1]
    D = clip_feat.shape[-1]
    R = B * Q

    # --- matcher output -> permutation indices (host-side python lists) ------
    if len(indices) and sum(len(src) for src, _ in indices) > 0:
        batch_idx = np.concatenate(
            [np.full(len(src), i, np.int32) for i, (src, _) in enumerate(indices)])
        src_idx = np.concatenate([np.asarray(src, np.int32) for src, _ in indices])
    else:
        batch_idx = np.zeros((0,), np.int32)
        src_idx = np.zeros((0,), np.int32)
    M = int(src_idx.shape[0])

    num_interactions = float(sum(len(t['hoi_labels']) for t in targets))
    num_interactions = max(num_interactions, 1.0)

    # --- matched target data (targets are host data; indices are host lists) -
    if M > 0:
        target_classes_o = np.concatenate(
            [np.asarray(t['obj_labels'], np.int32)[np.asarray(J, np.int32)]
             for t, (_, J) in zip(targets, indices)])
        target_hoi_o = np.concatenate(
            [np.asarray(t['hoi_labels'], np.float32)[np.asarray(J, np.int32)]
             for t, (_, J) in zip(targets, indices)], axis=0)
        tgt_sub_o = np.concatenate(
            [np.asarray(t['sub_boxes'], np.float32)[np.asarray(J, np.int32)]
             for t, (_, J) in zip(targets, indices)], axis=0)
        tgt_obj_o = np.concatenate(
            [np.asarray(t['obj_boxes'], np.float32)[np.asarray(J, np.int32)]
             for t, (_, J) in zip(targets, indices)], axis=0)
    else:
        target_classes_o = np.zeros((0,), np.int32)
        target_hoi_o = np.zeros((0, num_hoi), np.float32)
        tgt_sub_o = np.zeros((0, 4), np.float32)
        tgt_obj_o = np.zeros((0, 4), np.float32)

    # --- dense targets built ON DEVICE (no device->host round trips) ---------
    target_classes = jnp.full((B, Q), num_obj_classes, jnp.int32)
    target_hoi = jnp.zeros((B, Q, num_hoi), jnp.float32)
    if M > 0:
        target_classes = target_classes.at[batch_idx, src_idx].set(
            jnp.asarray(target_classes_o))
        target_hoi = target_hoi.at[batch_idx, src_idx].set(
            jnp.asarray(target_hoi_o))

    # --- padded, lane-dense kernel operands -----------------------------------
    C_hoi_pad = _round_up(num_hoi, 128)
    C_obj_pad = _round_up(C_obj, 128)
    if R >= 256:
        ROW_TILE = 256                          # fits v7x 32 MiB scoped VMEM easily
        R_pad = _round_up(R, ROW_TILE)
    else:
        R_pad = _round_up(R, 8)
        ROW_TILE = R_pad

    hoi_logits = pred_hoi_logits.reshape(R, num_hoi).astype(jnp.float32)
    hoi_logits = jnp.pad(hoi_logits, ((0, R_pad - R), (0, C_hoi_pad - num_hoi)))
    # gt padded with 2.0 -> neither pos (==1) nor neg (<1); bf16 halves DMA bytes
    hoi_gt = jnp.pad(target_hoi.reshape(R, num_hoi),
                     ((0, R_pad - R), (0, C_hoi_pad - num_hoi)),
                     constant_values=2.0).astype(jnp.bfloat16)

    obj_logits = pred_obj_logits.reshape(R, C_obj).astype(jnp.float32)
    obj_logits = jnp.pad(obj_logits, ((0, 0), (0, C_obj_pad - C_obj)),
                         constant_values=-1e9)          # padded lanes: exp -> 0
    obj_logits = jnp.pad(obj_logits, ((0, R_pad - R), (0, 0)))
    obj_tgt = jnp.pad(target_classes.reshape(R, 1), ((0, R_pad - R), (0, 0)),
                      constant_values=-1)               # padded rows: weight 0

    empty_weight = np.ones((C_obj_pad,), np.float32)
    empty_weight[C_obj:] = 0.0
    empty_weight[num_obj_classes] = EOS_COEF
    empty_weight = jnp.asarray(empty_weight.reshape(1, C_obj_pad))

    # --- matched source boxes gathered ON DEVICE, packed lane-contiguous ------
    N_pad = max(8, _round_up(max(M, 1), 8))
    if M > 0:
        src_sub_m = pred_sub_boxes[batch_idx, src_idx]   # (M, 4)
        src_obj_m = pred_obj_boxes[batch_idx, src_idx]
        pad_n = N_pad - M

        def prow(x):
            return jnp.pad(jnp.asarray(x, jnp.float32), ((0, pad_n), (0, 0)))

        valid = jnp.pad(jnp.ones((M, 1), jnp.float32), ((0, pad_n), (0, 0)))
        box_pack = jnp.concatenate(
            [prow(src_sub_m), prow(src_obj_m), prow(tgt_sub_o), prow(tgt_obj_o),
             valid], axis=1)                             # (N_pad, 17)
    else:
        box_pack = jnp.zeros((N_pad, 17), jnp.float32)

    # --- single fused Pallas kernel --------------------------------------------
    sums = _run_fused_kernel(hoi_logits, hoi_gt, obj_logits, obj_tgt,
                             empty_weight, box_pack, clip_feat, hoi_feat,
                             ROW_TILE)

    pos_sum, neg_sum, num_pos = sums[0], sums[1], sums[2]
    safe_np = jnp.where(num_pos == 0.0, 1.0, num_pos)
    loss_hoi_labels = jnp.where(num_pos == 0.0, -neg_sum,
                                -(pos_sum + neg_sum) / safe_np)

    loss_obj_ce = sums[3] / sums[4]

    loss_sub_bbox = sums[5] / num_interactions
    loss_obj_bbox = sums[6] / (sums[7] + 0.0001)
    loss_sub_giou = sums[8] / num_interactions
    loss_obj_giou = sums[9] / (sums[7] + 0.0001)
    loss_rec = sums[10]

    # --- logging-only metrics: lazy jnp (stays on device, no host sync) --------
    if M > 0:
        t_cls_o = jnp.asarray(target_classes_o)
        obj_logits_m = pred_obj_logits[batch_idx, src_idx]          # (M, C_obj)
        obj_acc = 100.0 * jnp.mean(
            (jnp.argmax(obj_logits_m, axis=-1) == t_cls_o).astype(jnp.float32))
        obj_class_error = 100.0 - obj_acc

        hoi_logits_m = pred_hoi_logits[batch_idx, src_idx]          # (M, num_hoi)
        hoi_sig = jnp.clip(jax.nn.sigmoid(hoi_logits_m.astype(jnp.float32)),
                           0.0001, 1.0 - 0.0001)
        k = min(5, num_hoi)
        _, top_idx = jax.lax.top_k(hoi_sig, k)                      # (M, k)
        cls_iota = jnp.arange(num_hoi)[None, None, :]
        in_topk = jnp.any(top_idx[:, :, None] == cls_iota, axis=1)  # (M, num_hoi)
        tgt_pos = (jnp.asarray(target_hoi_o) == 1.0)
        n_tgt = jnp.sum(tgt_pos.astype(jnp.float32), axis=1)
        hits = jnp.sum((in_topk & tgt_pos).astype(jnp.float32), axis=1)
        acc_rows = jnp.where(n_tgt > 0.0, hits / jnp.maximum(n_tgt, 1.0), 0.0)
        hoi_class_error = 100.0 - 100.0 * jnp.sum(acc_rows) / max(M, 1)
    else:
        obj_class_error = jnp.float32(100.0)
        hoi_class_error = jnp.float32(100.0)

    return {
        'loss_hoi_labels': loss_hoi_labels,
        'hoi_class_error': hoi_class_error,
        'loss_obj_ce': loss_obj_ce,
        'obj_class_error': obj_class_error,
        'loss_sub_bbox': loss_sub_bbox,
        'loss_obj_bbox': loss_obj_bbox,
        'loss_sub_giou': loss_sub_giou,
        'loss_obj_giou': loss_obj_giou,
        'loss_rec': loss_rec,
    }


if __name__ == "__main__":
    B, Q = 2, 8
    NUM_OBJ = 4          # -> obj logits dim 5 (incl. no-object)
    NUM_HOI = 16
    D = 32

    key = jax.random.PRNGKey(0)
    ks = jax.random.split(key, 6)
    outputs = {
        'pred_obj_logits': jax.random.normal(ks[0], (B, Q, NUM_OBJ + 1), jnp.float32),
        'pred_hoi_logits': jax.random.normal(ks[1], (B, Q, NUM_HOI), jnp.float32),
        'pred_sub_boxes': jax.nn.sigmoid(jax.random.normal(ks[2], (B, Q, 4), jnp.float32)),
        'pred_obj_boxes': jax.nn.sigmoid(jax.random.normal(ks[3], (B, Q, 4), jnp.float32)),
        'clip_cls_feature': jax.random.normal(ks[4], (B, D), jnp.float32),
        'hoi_feature': jax.random.normal(ks[5], (B, D), jnp.float32),
    }

    # deterministic synthetic targets
    hoi0 = np.zeros((2, NUM_HOI), np.float32); hoi0[0, [2, 7]] = 1.0; hoi0[1, 5] = 1.0
    hoi1 = np.zeros((1, NUM_HOI), np.float32); hoi1[0, 11] = 1.0
    targets = [
        {'obj_labels': np.array([1, 3], np.int32),
         'hoi_labels': hoi0,
         'sub_boxes': np.array([[0.3, 0.3, 0.2, 0.2], [0.6, 0.5, 0.3, 0.4]], np.float32),
         'obj_boxes': np.array([[0.4, 0.4, 0.2, 0.3], [0.7, 0.6, 0.2, 0.2]], np.float32)},
        {'obj_labels': np.array([0], np.int32),
         'hoi_labels': hoi1,
         'sub_boxes': np.array([[0.5, 0.5, 0.4, 0.4]], np.float32),
         'obj_boxes': np.array([[0.5, 0.6, 0.3, 0.3]], np.float32)},
    ]
    # fixed deterministic matcher output: (src query idx, target idx) per batch
    indices = [([1, 3], [0, 1]), ([5], [0])]

    losses = set_criterion_hoi_forward(outputs, targets, indices, NUM_OBJ)
    losses = jax.block_until_ready(losses)
    for k in losses:
        _ = float(losses[k])  # force host materialization
    print("KERNEL_OK")
</pallas_src>

<mosaic_0001>
module attributes {stable_mosaic.version = 11 : i64} {
  func.func @_fused_loss_kernel(%arg0: i32, %arg1: memref<16x128xf32, #tpu.memory_space<vmem>>, %arg2: memref<16x128xbf16, #tpu.memory_space<vmem>>, %arg3: memref<16x128xf32, #tpu.memory_space<vmem>>, %arg4: memref<16x1xi32, #tpu.memory_space<vmem>>, %arg5: memref<1x128xf32, #tpu.memory_space<vmem>>, %arg6: memref<8x17xf32, #tpu.memory_space<vmem>>, %arg7: memref<2x32xf32, #tpu.memory_space<vmem>>, %arg8: memref<2x32xf32, #tpu.memory_space<vmem>>, %arg9: memref<11xf32, #tpu.memory_space<smem>>) attributes {dimension_semantics = [#tpu.dimension_semantics<arbitrary>], iteration_bounds = array<i64: 1>, scalar_prefetch = 0 : i64, scratch_operands = 0 : i64, tpu.core_type = #tpu.core_type<tc>, window_params = [{transform_indices = @transform_0, window_bounds = array<i64: 16, 128>}, {transform_indices = @transform_1, window_bounds = array<i64: 16, 128>}, {transform_indices = @transform_2, window_bounds = array<i64: 16, 128>}, {transform_indices = @transform_3, window_bounds = array<i64: 16, 1>}, {pipeline_mode = #tpu.pipeline_mode<synchronous>, transform_indices = @transform_4, window_bounds = array<i64: 1, 128>}, {pipeline_mode = #tpu.pipeline_mode<synchronous>, transform_indices = @transform_5, window_bounds = array<i64: 8, 17>}, {pipeline_mode = #tpu.pipeline_mode<synchronous>, transform_indices = @transform_6, window_bounds = array<i64: 2, 32>}, {pipeline_mode = #tpu.pipeline_mode<synchronous>, transform_indices = @transform_7, window_bounds = array<i64: 2, 32>}, {transform_indices = @transform_8, window_bounds = array<i64: 11>}]} {
    %c0_i32 = arith.constant 0 : i32
    %0 = arith.cmpi eq, %arg0, %c0_i32 : i32
    %1 = arith.extui %0 : i1 to i32
    %c0_i32_0 = arith.constant 0 : i32
    %2 = arith.cmpi ne, %1, %c0_i32_0 : i32
    scf.if %2 {
      %cst_33 = arith.constant 0.000000e+00 : f32
      %c0_34 = arith.constant 0 : index
      %100 = memref.load %arg9[%c0_34] : memref<11xf32, #tpu.memory_space<smem>>
      memref.store %cst_33, %arg9[%c0_34] : memref<11xf32, #tpu.memory_space<smem>>
      %cst_35 = arith.constant 0.000000e+00 : f32
      %c1_36 = arith.constant 1 : index
      %101 = memref.load %arg9[%c1_36] : memref<11xf32, #tpu.memory_space<smem>>
      memref.store %cst_35, %arg9[%c1_36] : memref<11xf32, #tpu.memory_space<smem>>
      %cst_37 = arith.constant 0.000000e+00 : f32
      %c2_38 = arith.constant 2 : index
      %102 = memref.load %arg9[%c2_38] : memref<11xf32, #tpu.memory_space<smem>>
      memref.store %cst_37, %arg9[%c2_38] : memref<11xf32, #tpu.memory_space<smem>>
      %cst_39 = arith.constant 0.000000e+00 : f32
      %c3_40 = arith.constant 3 : index
      %103 = memref.load %arg9[%c3_40] : memref<11xf32, #tpu.memory_space<smem>>
      memref.store %cst_39, %arg9[%c3_40] : memref<11xf32, #tpu.memory_space<smem>>
      %cst_41 = arith.constant 0.000000e+00 : f32
      %c4_42 = arith.constant 4 : index
      %104 = memref.load %arg9[%c4_42] : memref<11xf32, #tpu.memory_space<smem>>
      memref.store %cst_41, %arg9[%c4_42] : memref<11xf32, #tpu.memory_space<smem>>
      %c0_43 = arith.constant 0 : index
      %c0_44 = arith.constant 0 : index
      %105 = vector.load %arg6[%c0_43, %c0_44] : memref<8x17xf32, #tpu.memory_space<vmem>>, vector<8x17xf32>
      %106 = vector.extract_strided_slice %105 {offsets = [0, 0], sizes = [8, 4], strides = [1, 1]} : vector<8x17xf32> to vector<8x4xf32>
      %107 = vector.extract_strided_slice %105 {offsets = [0, 4], sizes = [8, 4], strides = [1, 1]} : vector<8x17xf32> to vector<8x4xf32>
      %108 = vector.extract_strided_slice %105 {offsets = [0, 8], sizes = [8, 4], strides = [1, 1]} : vector<8x17xf32> to vector<8x4xf32>
      %109 = vector.extract_strided_slice %105 {offsets = [0, 12], sizes = [8, 4], strides = [1, 1]} : vector<8x17xf32> to vector<8x4xf32>
      %110 = vector.extract_strided_slice %105 {offsets = [0, 16], sizes = [8, 1], strides = [1, 1]} : vector<8x17xf32> to vector<8x1xf32>
      %cst_45 = arith.constant 0.000000e+00 : f32
      %111 = vector.broadcast %cst_45 : f32 to vector<8x4xf32>
      %112 = arith.cmpf one, %109, %111 : vector<8x4xf32>
      %113 = arith.extui %112 : vector<8x4xi1> to vector<8x4xi32>
      %114 = arith.sitofp %113 : vector<8x4xi32> to vector<8x4xf32>
      %cst_46 = arith.constant dense<0.000000e+00> : vector<8xf32>
      %115 = vector.multi_reduction <add>, %114, %cst_46 [1] : vector<8x4xf32> to vector<8xf32>
      %116 = vector.shape_cast %115 : vector<8xf32> to vector<8x1xf32>
      %cst_47 = arith.constant 0.000000e+00 : f32
      %117 = vector.broadcast %cst_47 : f32 to vector<8x1xf32>
      %118 = arith.cmpf ogt, %116, %117 : vector<8x1xf32>
      %119 = arith.extui %118 : vector<8x1xi1> to vector<8x1xi32>
      %120 = arith.sitofp %119 : vector<8x1xi32> to vector<8x1xf32>
      %121 = arith.subf %106, %108 : vector<8x4xf32>
      %122 = math.absf %121 : vector<8x4xf32>
      %123 = vector.broadcast %110 : vector<8x1xf32> to vector<8x4xf32>
      %124 = arith.mulf %122, %123 : vector<8x4xf32>
      %125 = vector.shape_cast %124 : vector<8x4xf32> to vector<1x8x4xf32>
      %cst_48 = arith.constant dense<0.000000e+00> : vector<1xf32>
      %126 = vector.multi_reduction <add>, %125, %cst_48 [1, 2] : vector<1x8x4xf32> to vector<1xf32>
      %127 = vector.shape_cast %126 : vector<1xf32> to vector<1x1x1xf32>
      %128 = vector.extract %127[0, 0, 0] : f32 from vector<1x1x1xf32>
      %c5 = arith.constant 5 : index
      %129 = memref.load %arg9[%c5] : memref<11xf32, #tpu.memory_space<smem>>
      memref.store %128, %arg9[%c5] : memref<11xf32, #tpu.memory_space<smem>>
      %130 = arith.subf %107, %109 : vector<8x4xf32>
      %131 = math.absf %130 : vector<8x4xf32>
      %132 = vector.broadcast %120 : vector<8x1xf32> to vector<8x4xf32>
      %133 = arith.mulf %131, %132 : vector<8x4xf32>
      %134 = vector.shape_cast %133 : vector<8x4xf32> to vector<1x8x4xf32>
      %cst_49 = arith.constant dense<0.000000e+00> : vector<1xf32>
      %135 = vector.multi_reduction <add>, %134, %cst_49 [1, 2] : vector<1x8x4xf32> to vector<1xf32>
      %136 = vector.shape_cast %135 : vector<1xf32> to vector<1x1x1xf32>
      %137 = vector.extract %136[0, 0, 0] : f32 from vector<1x1x1xf32>
      %c6 = arith.constant 6 : index
      %138 = memref.load %arg9[%c6] : memref<11xf32, #tpu.memory_space<smem>>
      memref.store %137, %arg9[%c6] : memref<11xf32, #tpu.memory_space<smem>>
      %139 = vector.shape_cast %120 : vector<8x1xf32> to vector<1x8x1xf32>
      %cst_50 = arith.constant dense<0.000000e+00> : vector<1xf32>
      %140 = vector.multi_reduction <add>, %139, %cst_50 [1, 2] : vector<1x8x1xf32> to vector<1xf32>
      %141 = vector.shape_cast %140 : vector<1xf32> to vector<1x1x1xf32>
      %142 = vector.extract %141[0, 0, 0] : f32 from vector<1x1x1xf32>
      %c7 = arith.constant 7 : index
      %143 = memref.load %arg9[%c7] : memref<11xf32, #tpu.memory_space<smem>>
      memref.store %142, %arg9[%c7] : memref<11xf32, #tpu.memory_space<smem>>
      %144 = vector.extract_strided_slice %106 {offsets = [0, 0], sizes = [8, 1], strides = [1, 1]} : vector<8x4xf32> to vector<8x1xf32>
      %145 = vector.extract_strided_slice %106 {offsets = [0, 2], sizes = [8, 1], strides = [1, 1]} : vector<8x4xf32> to vector<8x1xf32>
      %cst_51 = arith.constant 5.000000e-01 : f32
      %146 = vector.broadcast %cst_51 : f32 to vector<8x1xf32>
      %147 = arith.mulf %146, %145 : vector<8x1xf32>
      %148 = arith.subf %144, %147 : vector<8x1xf32>
      %149 = vector.extract_strided_slice %106 {offsets = [0, 1], sizes = [8, 1], strides = [1, 1]} : vector<8x4xf32> to vector<8x1xf32>
      %150 = vector.extract_strided_slice %106 {offsets = [0, 3], sizes = [8, 1], strides = [1, 1]} : vector<8x4xf32> to vector<8x1xf32>
      %cst_52 = arith.constant 5.000000e-01 : f32
      %151 = vector.broadcast %cst_52 : f32 to vector<8x1xf32>
      %152 = arith.mulf %151, %150 : vector<8x1xf32>
      %153 = arith.subf %149, %152 : vector<8x1xf32>
      %154 = vector.extract_strided_slice %106 {offsets = [0, 0], sizes = [8, 1], strides = [1, 1]} : vector<8x4xf32> to vector<8x1xf32>
      %155 = vector.extract_strided_slice %106 {offsets = [0, 2], sizes = [8, 1], strides = [1, 1]} : vector<8x4xf32> to vector<8x1xf32>
      %cst_53 = arith.constant 5.000000e-01 : f32
      %156 = vector.broadcast %cst_53 : f32 to vector<8x1xf32>
      %157 = arith.mulf %156, %155 : vector<8x1xf32>
      %158 = arith.addf %154, %157 : vector<8x1xf32>
      %159 = vector.extract_strided_slice %106 {offsets = [0, 1], sizes = [8, 1], strides = [1, 1]} : vector<8x4xf32> to vector<8x1xf32>
      %160 = vector.extract_strided_slice %106 {offsets = [0, 3], sizes = [8, 1], strides = [1, 1]} : vector<8x4xf32> to vector<8x1xf32>
      %cst_54 = arith.constant 5.000000e-01 : f32
      %161 = vector.broadcast %cst_54 : f32 to vector<8x1xf32>
      %162 = arith.mulf %161, %160 : vector<8x1xf32>
      %163 = arith.addf %159, %162 : vector<8x1xf32>
      %164 = vector.extract_strided_slice %108 {offsets = [0, 0], sizes = [8, 1], strides = [1, 1]} : vector<8x4xf32> to vector<8x1xf32>
      %165 = vector.extract_strided_slice %108 {offsets = [0, 2], sizes = [8, 1], strides = [1, 1]} : vector<8x4xf32> to vector<8x1xf32>
      %cst_55 = arith.constant 5.000000e-01 : f32
      %166 = vector.broadcast %cst_55 : f32 to vector<8x1xf32>
      %167 = arith.mulf %166, %165 : vector<8x1xf32>
      %168 = arith.subf %164, %167 : vector<8x1xf32>
      %169 = vector.extract_strided_slice %108 {offsets = [0, 1], sizes = [8, 1], strides = [1, 1]} : vector<8x4xf32> to vector<8x1xf32>
      %170 = vector.extract_strided_slice %108 {offsets = [0, 3], sizes = [8, 1], strides = [1, 1]} : vector<8x4xf32> to vector<8x1xf32>
      %cst_56 = arith.constant 5.000000e-01 : f32
      %171 = vector.broadcast %cst_56 : f32 to vector<8x1xf32>
      %172 = arith.mulf %171, %170 : vector<8x1xf32>
      %173 = arith.subf %169, %172 : vector<8x1xf32>
      %174 = vector.extract_strided_slice %108 {offsets = [0, 0], sizes = [8, 1], strides = [1, 1]} : vector<8x4xf32> to vector<8x1xf32>
      %175 = vector.extract_strided_slice %108 {offsets = [0, 2], sizes = [8, 1], strides = [1, 1]} : vector<8x4xf32> to vector<8x1xf32>
      %cst_57 = arith.constant 5.000000e-01 : f32
      %176 = vector.broadcast %cst_57 : f32 to vector<8x1xf32>
      %177 = arith.mulf %176, %175 : vector<8x1xf32>
      %178 = arith.addf %174, %177 : vector<8x1xf32>
      %179 = vector.extract_strided_slice %108 {offsets = [0, 1], sizes = [8, 1], strides = [1, 1]} : vector<8x4xf32> to vector<8x1xf32>
      %180 = vector.extract_strided_slice %108 {offsets = [0, 3], sizes = [8, 1], strides = [1, 1]} : vector<8x4xf32> to vector<8x1xf32>
      %cst_58 = arith.constant 5.000000e-01 : f32
      %181 = vector.broadcast %cst_58 : f32 to vector<8x1xf32>
      %182 = arith.mulf %181, %180 : vector<8x1xf32>
      %183 = arith.addf %179, %182 : vector<8x1xf32>
      %184 = arith.subf %158, %148 : vector<8x1xf32>
      %185 = arith.subf %163, %153 : vector<8x1xf32>
      %186 = arith.mulf %184, %185 : vector<8x1xf32>
      %187 = arith.subf %178, %168 : vector<8x1xf32>
      %188 = arith.subf %183, %173 : vector<8x1xf32>
      %189 = arith.mulf %187, %188 : vector<8x1xf32>
      %190 = arith.minimumf %158, %178 : vector<8x1xf32>
      %191 = arith.maximumf %148, %168 : vector<8x1xf32>
      %192 = arith.subf %190, %191 : vector<8x1xf32>
      %cst_59 = arith.constant 0.000000e+00 : f32
      %193 = vector.broadcast %cst_59 : f32 to vector<8x1xf32>
      %194 = arith.maximumf %192, %193 : vector<8x1xf32>
      %195 = arith.minimumf %163, %183 : vector<8x1xf32>
      %196 = arith.maximumf %153, %173 : vector<8x1xf32>
      %197 = arith.subf %195, %196 : vector<8x1xf32>
      %cst_60 = arith.constant 0.000000e+00 : f32
      %198 = vector.broadcast %cst_60 : f32 to vector<8x1xf32>
      %199 = arith.maximumf %197, %198 : vector<8x1xf32>
      %200 = arith.mulf %194, %199 : vector<8x1xf32>
      %201 = arith.addf %186, %189 : vector<8x1xf32>
      %202 = arith.subf %201, %200 : vector<8x1xf32>
      %cst_61 = arith.constant 0.000000e+00 : f32
      %203 = vector.broadcast %cst_61 : f32 to vector<8x1xf32>
      %204 = arith.cmpf ogt, %202, %203 : vector<8x1xf32>
      %cst_62 = arith.constant 1.000000e+00 : f32
      %205 = vector.broadcast %cst_62 : f32 to vector<8x1xf32>
      %206 = arith.select %204, %202, %205 : vector<8x1xi1>, vector<8x1xf32>
      %207 = arith.divf %200, %206 : vector<8x1xf32>
      %208 = arith.maximumf %158, %178 : vector<8x1xf32>
      %209 = arith.minimumf %148, %168 : vector<8x1xf32>
      %210 = arith.subf %208, %209 : vector<8x1xf32>
      %cst_63 = arith.constant 0.000000e+00 : f32
      %211 = vector.broadcast %cst_63 : f32 to vector<8x1xf32>
      %212 = arith.maximumf %210, %211 : vector<8x1xf32>
      %213 = arith.maximumf %163, %183 : vector<8x1xf32>
      %214 = arith.minimumf %153, %173 : vector<8x1xf32>
      %215 = arith.subf %213, %214 : vector<8x1xf32>
      %cst_64 = arith.constant 0.000000e+00 : f32
      %216 = vector.broadcast %cst_64 : f32 to vector<8x1xf32>
      %217 = arith.maximumf %215, %216 : vector<8x1xf32>
      %218 = arith.mulf %212, %217 : vector<8x1xf32>
      %cst_65 = arith.constant 0.000000e+00 : f32
      %219 = vector.broadcast %cst_65 : f32 to vector<8x1xf32>
      %220 = arith.cmpf ogt, %218, %219 : vector<8x1xf32>
      %cst_66 = arith.constant 1.000000e+00 : f32
      %221 = vector.broadcast %cst_66 : f32 to vector<8x1xf32>
      %222 = arith.select %220, %218, %221 : vector<8x1xi1>, vector<8x1xf32>
      %223 = arith.subf %218, %202 : vector<8x1xf32>
      %224 = arith.divf %223, %222 : vector<8x1xf32>
      %225 = arith.subf %207, %224 : vector<8x1xf32>
      %cst_67 = arith.constant 1.000000e+00 : f32
      %226 = vector.broadcast %cst_67 : f32 to vector<8x1xf32>
      %227 = arith.subf %226, %225 : vector<8x1xf32>
      %228 = arith.mulf %227, %110 : vector<8x1xf32>
      %229 = vector.shape_cast %228 : vector<8x1xf32> to vector<1x8x1xf32>
      %cst_68 = arith.constant dense<0.000000e+00> : vector<1xf32>
      %230 = vector.multi_reduction <add>, %229, %cst_68 [1, 2] : vector<1x8x1xf32> to vector<1xf32>
      %231 = vector.shape_cast %230 : vector<1xf32> to vector<1x1x1xf32>
      %232 = vector.extract %231[0, 0, 0] : f32 from vector<1x1x1xf32>
      %c8 = arith.constant 8 : index
      %233 = memref.load %arg9[%c8] : memref<11xf32, #tpu.memory_space<smem>>
      memref.store %232, %arg9[%c8] : memref<11xf32, #tpu.memory_space<smem>>
      %234 = vector.extract_strided_slice %107 {offsets = [0, 0], sizes = [8, 1], strides = [1, 1]} : vector<8x4xf32> to vector<8x1xf32>
      %235 = vector.extract_strided_slice %107 {offsets = [0, 2], sizes = [8, 1], strides = [1, 1]} : vector<8x4xf32> to vector<8x1xf32>
      %cst_69 = arith.constant 5.000000e-01 : f32
      %236 = vector.broadcast %cst_69 : f32 to vector<8x1xf32>
      %237 = arith.mulf %236, %235 : vector<8x1xf32>
      %238 = arith.subf %234, %237 : vector<8x1xf32>
      %239 = vector.extract_strided_slice %107 {offsets = [0, 1], sizes = [8, 1], strides = [1, 1]} : vector<8x4xf32> to vector<8x1xf32>
      %240 = vector.extract_strided_slice %107 {offsets = [0, 3], sizes = [8, 1], strides = [1, 1]} : vector<8x4xf32> to vector<8x1xf32>
      %cst_70 = arith.constant 5.000000e-01 : f32
      %241 = vector.broadcast %cst_70 : f32 to vector<8x1xf32>
      %242 = arith.mulf %241, %240 : vector<8x1xf32>
      %243 = arith.subf %239, %242 : vector<8x1xf32>
      %244 = vector.extract_strided_slice %107 {offsets = [0, 0], sizes = [8, 1], strides = [1, 1]} : vector<8x4xf32> to vector<8x1xf32>
      %245 = vector.extract_strided_slice %107 {offsets = [0, 2], sizes = [8, 1], strides = [1, 1]} : vector<8x4xf32> to vector<8x1xf32>
      %cst_71 = arith.constant 5.000000e-01 : f32
      %246 = vector.broadcast %cst_71 : f32 to vector<8x1xf32>
      %247 = arith.mulf %246, %245 : vector<8x1xf32>
      %248 = arith.addf %244, %247 : vector<8x1xf32>
      %249 = vector.extract_strided_slice %107 {offsets = [0, 1], sizes = [8, 1], strides = [1, 1]} : vector<8x4xf32> to vector<8x1xf32>
      %250 = vector.extract_strided_slice %107 {offsets = [0, 3], sizes = [8, 1], strides = [1, 1]} : vector<8x4xf32> to vector<8x1xf32>
      %cst_72 = arith.constant 5.000000e-01 : f32
      %251 = vector.broadcast %cst_72 : f32 to vector<8x1xf32>
      %252 = arith.mulf %251, %250 : vector<8x1xf32>
      %253 = arith.addf %249, %252 : vector<8x1xf32>
      %254 = vector.extract_strided_slice %109 {offsets = [0, 0], sizes = [8, 1], strides = [1, 1]} : vector<8x4xf32> to vector<8x1xf32>
      %255 = vector.extract_strided_slice %109 {offsets = [0, 2], sizes = [8, 1], strides = [1, 1]} : vector<8x4xf32> to vector<8x1xf32>
      %cst_73 = arith.constant 5.000000e-01 : f32
      %256 = vector.broadcast %cst_73 : f32 to vector<8x1xf32>
      %257 = arith.mulf %256, %255 : vector<8x1xf32>
      %258 = arith.subf %254, %257 : vector<8x1xf32>
      %259 = vector.extract_strided_slice %109 {offsets = [0, 1], sizes = [8, 1], strides = [1, 1]} : vector<8x4xf32> to vector<8x1xf32>
      %260 = vector.extract_strided_slice %109 {offsets = [0, 3], sizes = [8, 1], strides = [1, 1]} : vector<8x4xf32> to vector<8x1xf32>
      %cst_74 = arith.constant 5.000000e-01 : f32
      %261 = vector.broadcast %cst_74 : f32 to vector<8x1xf32>
      %262 = arith.mulf %261, %260 : vector<8x1xf32>
      %263 = arith.subf %259, %262 : vector<8x1xf32>
      %264 = vector.extract_strided_slice %109 {offsets = [0, 0], sizes = [8, 1], strides = [1, 1]} : vector<8x4xf32> to vector<8x1xf32>
      %265 = vector.extract_strided_slice %109 {offsets = [0, 2], sizes = [8, 1], strides = [1, 1]} : vector<8x4xf32> to vector<8x1xf32>
      %cst_75 = arith.constant 5.000000e-01 : f32
      %266 = vector.broadcast %cst_75 : f32 to vector<8x1xf32>
      %267 = arith.mulf %266, %265 : vector<8x1xf32>
      %268 = arith.addf %264, %267 : vector<8x1xf32>
      %269 = vector.extract_strided_slice %109 {offsets = [0, 1], sizes = [8, 1], strides = [1, 1]} : vector<8x4xf32> to vector<8x1xf32>
      %270 = vector.extract_strided_slice %109 {offsets = [0, 3], sizes = [8, 1], strides = [1, 1]} : vector<8x4xf32> to vector<8x1xf32>
      %cst_76 = arith.constant 5.000000e-01 : f32
      %271 = vector.broadcast %cst_76 : f32 to vector<8x1xf32>
      %272 = arith.mulf %271, %270 : vector<8x1xf32>
      %273 = arith.addf %269, %272 : vector<8x1xf32>
      %274 = arith.subf %248, %238 : vector<8x1xf32>
      %275 = arith.subf %253, %243 : vector<8x1xf32>
      %276 = arith.mulf %274, %275 : vector<8x1xf32>
      %277 = arith.subf %268, %258 : vector<8x1xf32>
      %278 = arith.subf %273, %263 : vector<8x1xf32>
      %279 = arith.mulf %277, %278 : vector<8x1xf32>
      %280 = arith.minimumf %248, %268 : vector<8x1xf32>
      %281 = arith.maximumf %238, %258 : vector<8x1xf32>
      %282 = arith.subf %280, %281 : vector<8x1xf32>
      %cst_77 = arith.constant 0.000000e+00 : f32
      %283 = vector.broadcast %cst_77 : f32 to vector<8x1xf32>
      %284 = arith.maximumf %282, %283 : vector<8x1xf32>
      %285 = arith.minimumf %253, %273 : vector<8x1xf32>
      %286 = arith.maximumf %243, %263 : vector<8x1xf32>
      %287 = arith.subf %285, %286 : vector<8x1xf32>
      %cst_78 = arith.constant 0.000000e+00 : f32
      %288 = vector.broadcast %cst_78 : f32 to vector<8x1xf32>
      %289 = arith.maximumf %287, %288 : vector<8x1xf32>
      %290 = arith.mulf %284, %289 : vector<8x1xf32>
      %291 = arith.addf %276, %279 : vector<8x1xf32>
      %292 = arith.subf %291, %290 : vector<8x1xf32>
      %cst_79 = arith.constant 0.000000e+00 : f32
      %293 = vector.broadcast %cst_79 : f32 to vector<8x1xf32>
      %294 = arith.cmpf ogt, %292, %293 : vector<8x1xf32>
      %cst_80 = arith.constant 1.000000e+00 : f32
      %295 = vector.broadcast %cst_80 : f32 to vector<8x1xf32>
      %296 = arith.select %294, %292, %295 : vector<8x1xi1>, vector<8x1xf32>
      %297 = arith.divf %290, %296 : vector<8x1xf32>
      %298 = arith.maximumf %248, %268 : vector<8x1xf32>
      %299 = arith.minimumf %238, %258 : vector<8x1xf32>
      %300 = arith.subf %298, %299 : vector<8x1xf32>
      %cst_81 = arith.constant 0.000000e+00 : f32
      %301 = vector.broadcast %cst_81 : f32 to vector<8x1xf32>
      %302 = arith.maximumf %300, %301 : vector<8x1xf32>
      %303 = arith.maximumf %253, %273 : vector<8x1xf32>
      %304 = arith.minimumf %243, %263 : vector<8x1xf32>
      %305 = arith.subf %303, %304 : vector<8x1xf32>
      %cst_82 = arith.constant 0.000000e+00 : f32
      %306 = vector.broadcast %cst_82 : f32 to vector<8x1xf32>
      %307 = arith.maximumf %305, %306 : vector<8x1xf32>
      %308 = arith.mulf %302, %307 : vector<8x1xf32>
      %cst_83 = arith.constant 0.000000e+00 : f32
      %309 = vector.broadcast %cst_83 : f32 to vector<8x1xf32>
      %310 = arith.cmpf ogt, %308, %309 : vector<8x1xf32>
      %cst_84 = arith.constant 1.000000e+00 : f32
      %311 = vector.broadcast %cst_84 : f32 to vector<8x1xf32>
      %312 = arith.select %310, %308, %311 : vector<8x1xi1>, vector<8x1xf32>
      %313 = arith.subf %308, %292 : vector<8x1xf32>
      %314 = arith.divf %313, %312 : vector<8x1xf32>
      %315 = arith.subf %297, %314 : vector<8x1xf32>
      %cst_85 = arith.constant 1.000000e+00 : f32
      %316 = vector.broadcast %cst_85 : f32 to vector<8x1xf32>
      %317 = arith.subf %316, %315 : vector<8x1xf32>
      %318 = arith.mulf %317, %120 : vector<8x1xf32>
      %319 = vector.shape_cast %318 : vector<8x1xf32> to vector<1x8x1xf32>
      %cst_86 = arith.constant dense<0.000000e+00> : vector<1xf32>
      %320 = vector.multi_reduction <add>, %319, %cst_86 [1, 2] : vector<1x8x1xf32> to vector<1xf32>
      %321 = vector.shape_cast %320 : vector<1xf32> to vector<1x1x1xf32>
      %322 = vector.extract %321[0, 0, 0] : f32 from vector<1x1x1xf32>
      %c9 = arith.constant 9 : index
      %323 = memref.load %arg9[%c9] : memref<11xf32, #tpu.memory_space<smem>>
      memref.store %322, %arg9[%c9] : memref<11xf32, #tpu.memory_space<smem>>
      %c0_87 = arith.constant 0 : index
      %c0_88 = arith.constant 0 : index
      %324 = vector.load %arg7[%c0_87, %c0_88] : memref<2x32xf32, #tpu.memory_space<vmem>>, vector<2x32xf32>
      %c0_89 = arith.constant 0 : index
      %c0_90 = arith.constant 0 : index
      %325 = vector.load %arg8[%c0_89, %c0_90] : memref<2x32xf32, #tpu.memory_space<vmem>>, vector<2x32xf32>
      %326 = arith.subf %324, %325 : vector<2x32xf32>
      %327 = math.absf %326 : vector<2x32xf32>
      %328 = vector.shape_cast %327 : vector<2x32xf32> to vector<1x2x32xf32>
      %cst_91 = arith.constant dense<0.000000e+00> : vector<1xf32>
      %329 = vector.multi_reduction <add>, %328, %cst_91 [1, 2] : vector<1x2x32xf32> to vector<1xf32>
      %330 = vector.shape_cast %329 : vector<1xf32> to vector<1x1x1xf32>
      %331 = vector.extract %330[0, 0, 0] : f32 from vector<1x1x1xf32>
      %cst_92 = arith.constant 6.400000e+01 : f32
      %332 = arith.divf %331, %cst_92 : f32
      %c10 = arith.constant 10 : index
      %333 = memref.load %arg9[%c10] : memref<11xf32, #tpu.memory_space<smem>>
      memref.store %332, %arg9[%c10] : memref<11xf32, #tpu.memory_space<smem>>
    } else {
    }
    %c0 = arith.constant 0 : index
    %c0_1 = arith.constant 0 : index
    %3 = vector.load %arg1[%c0, %c0_1] : memref<16x128xf32, #tpu.memory_space<vmem>>, vector<16x128xf32>
    %c0_2 = arith.constant 0 : index
    %c0_3 = arith.constant 0 : index
    %4 = vector.load %arg2[%c0_2, %c0_3] : memref<16x128xbf16, #tpu.memory_space<vmem>>, vector<16x128xbf16>
    %5 = arith.extf %4 : vector<16x128xbf16> to vector<16x128xf32>
    %6 = arith.negf %3 : vector<16x128xf32>
    %7 = math.exp %6 : vector<16x128xf32>
    %cst = arith.constant 1.000000e+00 : f32
    %8 = vector.broadcast %cst : f32 to vector<16x128xf32>
    %9 = arith.addf %8, %7 : vector<16x128xf32>
    %10 = arith.divf %8, %9 : vector<16x128xf32>
    %cst_4 = arith.constant 9.99999974E-5 : f32
    %cst_5 = arith.constant 0.999899983 : f32
    %11 = vector.broadcast %cst_4 : f32 to vector<16x128xf32>
    %12 = arith.maximumf %11, %10 : vector<16x128xf32>
    %13 = vector.broadcast %cst_5 : f32 to vector<16x128xf32>
    %14 = arith.minimumf %13, %12 : vector<16x128xf32>
    %cst_6 = arith.constant 1.000000e+00 : f32
    %15 = vector.broadcast %cst_6 : f32 to vector<16x128xf32>
    %16 = arith.cmpf oeq, %5, %15 : vector<16x128xf32>
    %17 = arith.extui %16 : vector<16x128xi1> to vector<16x128xi32>
    %18 = arith.sitofp %17 : vector<16x128xi32> to vector<16x128xf32>
    %cst_7 = arith.constant 1.000000e+00 : f32
    %19 = vector.broadcast %cst_7 : f32 to vector<16x128xf32>
    %20 = arith.cmpf olt, %5, %19 : vector<16x128xf32>
    %21 = arith.extui %20 : vector<16x128xi1> to vector<16x128xi32>
    %22 = arith.sitofp %21 : vector<16x128xi32> to vector<16x128xf32>
    %c0_8 = arith.constant 0 : index
    %23 = memref.load %arg9[%c0_8] : memref<11xf32, #tpu.memory_space<smem>>
    %24 = math.log %14 : vector<16x128xf32>
    %cst_9 = arith.constant 5.000000e-01 : f32
    %25 = vector.broadcast %cst_9 : f32 to vector<16x128xf32>
    %26 = arith.mulf %25, %24 : vector<16x128xf32>
    %cst_10 = arith.constant 1.000000e+00 : f32
    %27 = vector.broadcast %cst_10 : f32 to vector<16x128xf32>
    %28 = arith.subf %27, %14 : vector<16x128xf32>
    %29 = arith.mulf %28, %28 : vector<16x128xf32>
    %30 = arith.mulf %26, %29 : vector<16x128xf32>
    %31 = arith.mulf %30, %18 : vector<16x128xf32>
    %32 = vector.shape_cast %31 : vector<16x128xf32> to vector<1x16x128xf32>
    %cst_11 = arith.constant dense<0.000000e+00> : vector<1xf32>
    %33 = vector.multi_reduction <add>, %32, %cst_11 [1, 2] : vector<1x16x128xf32> to vector<1xf32>
    %34 = vector.shape_cast %33 : vector<1xf32> to vector<1x1x1xf32>
    %35 = vector.extract %34[0, 0, 0] : f32 from vector<1x1x1xf32>
    %36 = arith.addf %23, %35 : f32
    %c0_12 = arith.constant 0 : index
    %37 = memref.load %arg9[%c0_12] : memref<11xf32, #tpu.memory_space<smem>>
    memref.store %36, %arg9[%c0_12] : memref<11xf32, #tpu.memory_space<smem>>
    %c1 = arith.constant 1 : index
    %38 = memref.load %arg9[%c1] : memref<11xf32, #tpu.memory_space<smem>>
    %cst_13 = arith.constant 1.000000e+00 : f32
    %39 = vector.broadcast %cst_13 : f32 to vector<16x128xf32>
    %40 = arith.subf %39, %14 : vector<16x128xf32>
    %41 = math.log %40 : vector<16x128xf32>
    %cst_14 = arith.constant 5.000000e-01 : f32
    %42 = vector.broadcast %cst_14 : f32 to vector<16x128xf32>
    %43 = arith.mulf %42, %41 : vector<16x128xf32>
    %44 = arith.mulf %14, %14 : vector<16x128xf32>
    %45 = arith.mulf %43, %44 : vector<16x128xf32>
    %46 = arith.mulf %45, %22 : vector<16x128xf32>
    %47 = vector.shape_cast %46 : vector<16x128xf32> to vector<1x16x128xf32>
    %cst_15 = arith.constant dense<0.000000e+00> : vector<1xf32>
    %48 = vector.multi_reduction <add>, %47, %cst_15 [1, 2] : vector<1x16x128xf32> to vector<1xf32>
    %49 = vector.shape_cast %48 : vector<1xf32> to vector<1x1x1xf32>
    %50 = vector.extract %49[0, 0, 0] : f32 from vector<1x1x1xf32>
    %51 = arith.addf %38, %50 : f32
    %c1_16 = arith.constant 1 : index
    %52 = memref.load %arg9[%c1_16] : memref<11xf32, #tpu.memory_space<smem>>
    memref.store %51, %arg9[%c1_16] : memref<11xf32, #tpu.memory_space<smem>>
    %c2 = arith.constant 2 : index
    %53 = memref.load %arg9[%c2] : memref<11xf32, #tpu.memory_space<smem>>
    %54 = vector.shape_cast %18 : vector<16x128xf32> to vector<1x16x128xf32>
    %cst_17 = arith.constant dense<0.000000e+00> : vector<1xf32>
    %55 = vector.multi_reduction <add>, %54, %cst_17 [1, 2] : vector<1x16x128xf32> to vector<1xf32>
    %56 = vector.shape_cast %55 : vector<1xf32> to vector<1x1x1xf32>
    %57 = vector.extract %56[0, 0, 0] : f32 from vector<1x1x1xf32>
    %58 = arith.addf %53, %57 : f32
    %c2_18 = arith.constant 2 : index
    %59 = memref.load %arg9[%c2_18] : memref<11xf32, #tpu.memory_space<smem>>
    memref.store %58, %arg9[%c2_18] : memref<11xf32, #tpu.memory_space<smem>>
    %c0_19 = arith.constant 0 : index
    %c0_20 = arith.constant 0 : index
    %60 = vector.load %arg3[%c0_19, %c0_20] : memref<16x128xf32, #tpu.memory_space<vmem>>, vector<16x128xf32>
    %c0_21 = arith.constant 0 : index
    %c0_22 = arith.constant 0 : index
    %61 = vector.load %arg4[%c0_21, %c0_22] : memref<16x1xi32, #tpu.memory_space<vmem>>, vector<16x1xi32>
    %c0_23 = arith.constant 0 : index
    %c0_24 = arith.constant 0 : index
    %62 = vector.load %arg5[%c0_23, %c0_24] : memref<1x128xf32, #tpu.memory_space<vmem>>, vector<1x128xf32>
    %63 = tpu.iota {dimensions = array<i32: 1>} : vector<16x128xi32>
    %64 = vector.broadcast %61 : vector<16x1xi32> to vector<16x128xi32>
    %65 = arith.cmpi eq, %63, %64 : vector<16x128xi32>
    %66 = arith.extui %65 : vector<16x128xi1> to vector<16x128xi32>
    %67 = arith.sitofp %66 : vector<16x128xi32> to vector<16x128xf32>
    %cst_25 = arith.constant dense<0xFF800000> : vector<16xf32>
    %68 = vector.multi_reduction <maximumf>, %60, %cst_25 [1] : vector<16x128xf32> to vector<16xf32>
    %69 = vector.shape_cast %68 : vector<16xf32> to vector<16x1xf32>
    %70 = vector.broadcast %69 : vector<16x1xf32> to vector<16x128xf32>
    %71 = arith.subf %60, %70 : vector<16x128xf32>
    %72 = math.exp %71 : vector<16x128xf32>
    %cst_26 = arith.constant dense<0.000000e+00> : vector<16xf32>
    %73 = vector.multi_reduction <add>, %72, %cst_26 [1] : vector<16x128xf32> to vector<16xf32>
    %74 = vector.shape_cast %73 : vector<16xf32> to vector<16x1xf32>
    %75 = math.log %74 : vector<16x1xf32>
    %76 = arith.addf %69, %75 : vector<16x1xf32>
    %77 = arith.mulf %67, %60 : vector<16x128xf32>
    %cst_27 = arith.constant dense<0.000000e+00> : vector<16xf32>
    %78 = vector.multi_reduction <add>, %77, %cst_27 [1] : vector<16x128xf32> to vector<16xf32>
    %79 = vector.shape_cast %78 : vector<16xf32> to vector<16x1xf32>
    %80 = vector.broadcast %62 : vector<1x128xf32> to vector<16x128xf32>
    %81 = arith.mulf %67, %80 : vector<16x128xf32>
    %cst_28 = arith.constant dense<0.000000e+00> : vector<16xf32>
    %82 = vector.multi_reduction <add>, %81, %cst_28 [1] : vector<16x128xf32> to vector<16xf32>
    %83 = vector.shape_cast %82 : vector<16xf32> to vector<16x1xf32>
    %c3 = arith.constant 3 : index
    %84 = memref.load %arg9[%c3] : memref<11xf32, #tpu.memory_space<smem>>
    %85 = arith.subf %76, %79 : vector<16x1xf32>
    %86 = arith.mulf %83, %85 : vector<16x1xf32>
    %87 = vector.shape_cast %86 : vector<16x1xf32> to vector<1x16x1xf32>
    %cst_29 = arith.constant dense<0.000000e+00> : vector<1xf32>
    %88 = vector.multi_reduction <add>, %87, %cst_29 [1, 2] : vector<1x16x1xf32> to vector<1xf32>
    %89 = vector.shape_cast %88 : vector<1xf32> to vector<1x1x1xf32>
    %90 = vector.extract %89[0, 0, 0] : f32 from vector<1x1x1xf32>
    %91 = arith.addf %84, %90 : f32
    %c3_30 = arith.constant 3 : index
    %92 = memref.load %arg9[%c3_30] : memref<11xf32, #tpu.memory_space<smem>>
    memref.store %91, %arg9[%c3_30] : memref<11xf32, #tpu.memory_space<smem>>
    %c4 = arith.constant 4 : index
    %93 = memref.load %arg9[%c4] : memref<11xf32, #tpu.memory_space<smem>>
    %94 = vector.shape_cast %83 : vector<16x1xf32> to vector<1x16x1xf32>
    %cst_31 = arith.constant dense<0.000000e+00> : vector<1xf32>
    %95 = vector.multi_reduction <add>, %94, %cst_31 [1, 2] : vector<1x16x1xf32> to vector<1xf32>
    %96 = vector.shape_cast %95 : vector<1xf32> to vector<1x1x1xf32>
    %97 = vector.extract %96[0, 0, 0] : f32 from vector<1x1x1xf32>
    %98 = arith.addf %93, %97 : f32
    %c4_32 = arith.constant 4 : index
    %99 = memref.load %arg9[%c4_32] : memref<11xf32, #tpu.memory_space<smem>>
    memref.store %98, %arg9[%c4_32] : memref<11xf32, #tpu.memory_space<smem>>
    return
  }
  func.func @transform_0(%arg0: i32) -> (i32, i32) {
    %c0_i32 = arith.constant 0 : i32
    %c0_i32_0 = arith.constant 0 : i32
    return %arg0, %c0_i32 : i32, i32
  }
  func.func @transform_1(%arg0: i32) -> (i32, i32) {
    %c0_i32 = arith.constant 0 : i32
    %c0_i32_0 = arith.constant 0 : i32
    return %arg0, %c0_i32 : i32, i32
  }
  func.func @transform_2(%arg0: i32) -> (i32, i32) {
    %c0_i32 = arith.constant 0 : i32
    %c0_i32_0 = arith.constant 0 : i32
    return %arg0, %c0_i32 : i32, i32
  }
  func.func @transform_3(%arg0: i32) -> (i32, i32) {
    %c0_i32 = arith.constant 0 : i32
    %c0_i32_0 = arith.constant 0 : i32
    return %arg0, %c0_i32 : i32, i32
  }
  func.func @transform_4(%arg0: i32) -> (i32, i32) {
    %c0_i32 = arith.constant 0 : i32
    %c0_i32_0 = arith.constant 0 : i32
    %c0_i32_1 = arith.constant 0 : i32
    return %c0_i32, %c0_i32_0 : i32, i32
  }
  func.func @transform_5(%arg0: i32) -> (i32, i32) {
    %c0_i32 = arith.constant 0 : i32
    %c0_i32_0 = arith.constant 0 : i32
    %c0_i32_1 = arith.constant 0 : i32
    return %c0_i32, %c0_i32_0 : i32, i32
  }
  func.func @transform_6(%arg0: i32) -> (i32, i32) {
    %c0_i32 = arith.constant 0 : i32
    %c0_i32_0 = arith.constant 0 : i32
    %c0_i32_1 = arith.constant 0 : i32
    return %c0_i32, %c0_i32_0 : i32, i32
  }
  func.func @transform_7(%arg0: i32) -> (i32, i32) {
    %c0_i32 = arith.constant 0 : i32
    %c0_i32_0 = arith.constant 0 : i32
    %c0_i32_1 = arith.constant 0 : i32
    return %c0_i32, %c0_i32_0 : i32, i32
  }
  func.func @transform_8(%arg0: i32) -> i32 {
    %c0_i32 = arith.constant 0 : i32
    %c0_i32_0 = arith.constant 0 : i32
    return %c0_i32 : i32
  }
}

</mosaic_0001>

<bundles_post_ra>
// kernel: tpu_custom_call.1
= control target key start
LH: loop header
LB: loop body
LE: loop exit
PB: predicated region body
PF: predicated region fallthrough
CT: control target
= control target key end

     0   :  { %13 = vsyncpa [#allocation3], 0  ;;  %s824_s0 = inlined_call_operand.vmem [shape: f32[16,128], index: 0, kind: input, shape index: {}]   ;;  %s825_s1 = inlined_call_operand.hbm [shape: bf16[16,128], index: 1, kind: input, shape index: {}]   ;;  %s826_s2 = inlined_call_operand.hbm [shape: f32[16,128], index: 2, kind: input, shape index: {}]   ;;  %s827_s3 = inlined_call_operand.vmem [shape: s32[16,1], index: 3, kind: input, shape index: {}]   ;;  %s828_s4 = inlined_call_operand.hbm [shape: f32[1,128], index: 4, kind: input, shape index: {}]   ;;  %s829_s5 = inlined_call_operand.vmem [shape: f32[8,17], index: 5, kind: input, shape index: {}]   ;;  %s830_s6 = inlined_call_operand.vmem [shape: f32[2,32], index: 6, kind: input, shape index: {}]   ;;  %s831_s7 = inlined_call_operand.vmem [shape: f32[2,32], index: 7, kind: input, shape index: {}]   ;;  %s832_s8 = inlined_call_operand.hbm [shape: f32[11], index: 8, kind: output, shape index: {}]  }
   0x1   :  { %14 = vsyncpa [#allocation6], 0 }
   0x2   :  { %15 = vsyncpa [#allocation4], 0  ;;  %s636_s27 = smov [#allocation5]  }
   0x3   :  { %s35_s28 = sshll.u32 %s636_s27, 4  ;;  %s36_s28 = int_to_ptr.vmem [resolvable:$true] %s35_s28 }
   0x4   :  { %s570_s29 = scalar_lea.vmem %s36_s28, 256  ;;  %p575_p1 = scmp.lt.s32.totalorder %s36_s28, %s36_s28 }
   0x5   :  { %p571_p0 = scmp.ne.s32.totalorder %s36_s28, %s570_s29  ;;  %p576_p2 = scmp.lt.s32.totalorder %s570_s29, %s570_s29 }
   0x7   :  { %p577_p3 = por %p576_p2, %p575_p1 }
   0x9   :  { %p578_p4 = pnand %p577_p3, %p571_p0 }
   0xb   :  { %581 = shalt.err (!%p578_p4)
}
   0xc   :  { %s637_s30 = smov 128   ;;  %s638_s9 = smov 8  }
   0xd   :  { %41 = dma.hbm_to_vmem [thread:$0]  %s826_s2, 256, %s36_s28, [#allocation6], %s637_s30, %s637_s30, %s638_s9  }
   0xe   :  { %s639_s12 = smov [#allocation2]  }
   0xf   :  { %s23_s13 = sshll.u32 %s639_s12, 4  ;;  %s24_s13 = int_to_ptr.vmem [resolvable:$true] %s23_s13 }
  0x10   :  { %s590_s14 = scalar_lea.vmem %s24_s13, 128  ;;  %p595_p6 = scmp.lt.s32.totalorder %s24_s13, %s24_s13 }
  0x11   :  { %p591_p5 = scmp.ne.s32.totalorder %s24_s13, %s590_s14  ;;  %p596_p7 = scmp.lt.s32.totalorder %s590_s14, %s590_s14 }
  0x13   :  { %p597_p8 = por %p596_p7, %p595_p6 }
  0x15   :  { %p598_p9 = pnand %p597_p8, %p591_p5 }
  0x17   :  { %601 = shalt.err (!%p598_p9)
}
  0x18   :  { %s640_s15 = smov 64   ;;  %s641_s16 = smov 4  }
  0x19   :  { %29 = dma.hbm_to_vmem [thread:$0]  %s825_s1, 128, %s24_s13, [#allocation3], %s640_s15, %s640_s15, %s641_s16  }
  0x1a   :  { %s642_s19 = smov [#allocation7]  }
  0x1b   :  { %s50_s20 = sshll.u32 %s642_s19, 4  ;;  %s51_s20 = int_to_ptr.vmem [resolvable:$true] %s50_s20 }
  0x1c   :  { %s610_s2 = scalar_lea.vmem %s51_s20, 16  ;;  %s614_s21 = scalar_lea.vmem %s51_s20, 32 }
  0x1d   :  { %p611_p10 = scmp.ne.s32.totalorder %s51_s20, %s610_s2  ;;  %p615_p11 = scmp.lt.s32.totalorder %s51_s20, %s51_s20 }
  0x1e   :  { %p616_p12 = scmp.lt.s32.totalorder %s614_s21, %s610_s2 }
  0x20   :  { %p617_p13 = por %p616_p12, %p615_p11 }
  0x22   :  { %p618_p0 = pnand %p617_p13, %p611_p10 }
  0x24   :  { %621 = shalt.err (!%p618_p0)
}
  0x25   :  { %53 = dma.hbm_to_vmem [thread:$0]  %s828_s4, 16, %s51_s20, [#allocation6]  }
  0x26   :  { %630 = dma.done.wait [#allocation3], 128  }
  0x27   :  { %631 = vsyncadd [#allocation3], 4294967168 }
  0x28   :  { %632 = dma.done.wait [#allocation6], 272  }
  0x29   :  { %633 = vsyncadd [#allocation6], 4294967024  ;;  %v710_v0 = vld [vmem:[%s829_s5] sm:$0xff]  ;;  %s643_s25 = smov 126   ;;  %v644_v2 = vmov 0   ;;  %s645_s4 = smov 120   ;;  %v367_v34 = vlaneseq }
  0x2a   :  { %v151_v1 = vmul.f32 0.5, %v710_v0  ;;  %530 = vset.pattern.permute.xlu1 %v644_v2  ;;  %531 = vset.pattern.permute.xlu0 %v644_v2  ;;  %vm84_vm0 = vcmp.ne.f32.partialorder %v710_v0, 0.0  ;;  %v646_v6 = vmov 0.0   ;;  %s647_s5 = smov 127   ;;  %s648_s26 = smov 116   ;;  %v721_v9 = vld [vmem:[#allocation5 + $0x8] sm:$0xff] }
  0x2b   :  { %v471_v7 = vsel %vm84_vm0, 1.0, %v646_v6  ;;  %v362_v10 = vld [vmem:[#allocation5] sm:$0xff]  ;;  %v364_v11 = vld [vmem:[%s827_s3] sm:$0xff]  ;;  %v649_v25 = vmov 16   ;;  %vm91_vm1 = vcmask 31744   ;;  %v368_v35 = vand.u32 127, %v367_v34 }
  0x2c   :  { %153 = vrot.lane.b32.xlu0 %v151_v1, %s643_s25  ;;  %v365_v23 = vld [vmem:[%s827_s3 + $0x8] sm:$0xff]  ;;  %v483_v41 = vld [vmem:[#allocation7] ss:$0 sm:$0xff]  ;;  %v260_v43 = vld [vmem:[%s824_s0] sm:$0xff]  ;;  %s651_s12 = smov 124   ;;  %vm138_vm11 = vcmask 7168  }
  0x2d   :  { %v261_v44 = vld [vmem:[%s824_s0 + $0x8] sm:$0xff]  ;;  %v473_v45 = vmul.f32 -1.442695, %v260_v43  ;;  %s650_s0 = smov 112   ;;  %vm244_vm12 = vcmask 254976   ;;  %s652_s25 = smov [#allocation8]  }
  0x2e   :  { %v474_v46 = vmul.f32 -1.442695, %v261_v44 }
  0x9e   :  { %v154_v3 = vpop.permute.xlu0 %153 }
  0x9f   :  { %v156_v4 = vsub.f32 %v710_v0, %v154_v3  ;;  %v157_v5 = vadd.f32 %v154_v3, %v710_v0 }
  0xa1   :  { %165 = vrot.lane.b32.xlu0 %v157_v5, %s645_s4  ;;  %170 = vrot.lane.b32.xlu1 %v156_v4, %s645_s4  ;;  %v158_v8 = vsub.f32 %v157_v5, %v156_v4 }
  0xa5   :  { %160 = vrot.lane.b32.xlu1 %v158_v8, %s647_s5  ;;  %88 = vrot.lane.b32.xlu0 %v471_v7, %s648_s26 }
  0xc4   :  { %383 = vmax.xlane.f32.xlu0 %v721_v9 }
  0xc9   :  { %381 = vmax.xlane.f32.xlu1 %v362_v10 }
  0xda   :  { %370 = vperm.xlu1 %530, %v364_v11  }
 0x113   :  { %v166_v12 = vpop.permute.xlu0 %165  ;;  %v171_v13 = vpop.permute.xlu1 %170 }
 0x114   :  { %v168_v14 = vmin.f32 %v157_v5, %v166_v12  ;;  %v191_v15 = vmax.f32 %v157_v5, %v166_v12  ;;  %v173_v16 = vmax.f32 %v156_v4, %v171_v13  ;;  %v192_v17 = vmin.f32 %v156_v4, %v171_v13 }
 0x116   :  { %v727_v18 = vsub.f32 %v168_v14, %v173_v16  ;;  %v729_v20 = vsub.f32 %v191_v15, %v192_v17 }
 0x117   :  { %v161_v19 = vpop.permute.xlu1 %160  ;;  %v89_v26 = vpop.permute.xlu0 %88 }
 0x118   :  { %v731_v21 = vmul.f32 %v161_v19, %v158_v8  ;;  %v175_v22 = vmax.f32 %v727_v18, 0.0  ;;  %v194_v24 = vmax.f32 %v729_v20, 0.0  ;;  %v92_v27 = vsel %vm91_vm1, %v89_v26, 0.0  ;;  %v773_v8 = vld [vmem:[#allocation2] sm:$0xff]  }
 0x119   :  { %v488_v14 = vunpack.c.l.bf16 %v773_v8  ;;  %v489_v16 = vunpack.c.h.bf16 %v773_v8 }
 0x11a   :  { %182 = vrot.lane.b32.xlu1 %v731_v21, %s645_s4  ;;  %177 = vrot.lane.b32.xlu0 %v175_v22, %s647_s5 }
 0x11b   :  { %vm282_vm6 = vcmp.eq.f32.partialorder %v488_v14, 1.0  ;;  %vm283_vm7 = vcmp.eq.f32.partialorder %v489_v16, 1.0  ;;  %vm288_vm9 = vcmp.lt.f32.partialorder %v488_v14, 1.0  ;;  %vm289_vm10 = vcmp.lt.f32.partialorder %v489_v16, 1.0 }
 0x11e   :  { %196 = vrot.lane.b32.xlu1 %v194_v24, %s647_s5  ;;  %373 = vperm.xlu0 %531, %v365_v23   ;;  %v780_v23 = vsel %vm282_vm6, 1.0, %v646_v6 }
 0x122   :  { %99 = vrot.lane.b32.xlu0 %v710_v0, %s645_s4 }
 0x123   :  { %532 = vset.pattern.permute.xlu0 %v649_v25 }
 0x142   :  { %93 = vadd.xlane.f32.xlu1 %v92_v27 }
 0x14d   :  { %v745_v28 = vpop.xlane.xlu0 %383 }
 0x14e   :  { %v386_v29 = vsub.f32 %v721_v9, %v745_v28 }
 0x150   :  { %v389_v30 = vmul.f32 1.442695, %v386_v29 }
 0x152   :  { %534 = vpow2.f32 %v389_v30  ;;  %v749_v31 = vpop.xlane.xlu1 %381 }
 0x153   :  { %v385_v32 = vsub.f32 %v362_v10, %v749_v31 }
 0x155   :  { %v387_v33 = vmul.f32 1.442695, %v385_v32 }
 0x156   :  { %v371_v36 = vpop.permute.xlu1 %370 }
 0x157   :  { %536 = vpow2.f32 %v387_v33  ;;  %vm375_vm2 = vcmp.eq.s32.totalorder %v368_v35, %v371_v36 }
 0x158   :  { %v481_v38 = vsel %vm375_vm2, 1.0, %v646_v6  ;;  %538 = vpow2.f32 %v473_v45 }
 0x159   :  { %v401_v40 = vmul.f32 %v481_v38, %v362_v10  ;;  %v413_v42 = vmul.f32 %v483_v41, %v481_v38  ;;  %540 = vpow2.f32 %v474_v46 }
 0x15f   :  { %v535_v37 = vpop.eup %534 }
 0x160   :  { %393 = vadd.xlane.f32.xlu1 %v535_v37 }
 0x164   :  { %v537_v39 = vpop.eup %536 }
 0x165   :  { %391 = vadd.xlane.f32.xlu0 %v537_v39  ;;  %v539_v47 = vpop.eup %538 }
 0x166   :  { %v541_v48 = vpop.eup %540  ;;  %v272_v50 = vadd.f32 1.0, %v539_v47 }
 0x167   :  { %v273_v51 = vadd.f32 1.0, %v541_v48 }
 0x168   :  { %542 = vrcp.f32 %v272_v50 }
 0x169   :  { %403 = vadd.xlane.f32.xlu0 %v401_v40  ;;  %544 = vrcp.f32 %v273_v51  ;;  %v240_v51 = vld [vmem:[%s830_s6] sm:$0x3] }
 0x16d   :  { %415 = vadd.xlane.f32.xlu0 %v413_v42 }
 0x175   :  { %v543_v57 = vpop.eup %542 }
 0x176   :  { %v545_v58 = vpop.eup %544  ;;  %v278_v59 = vmax.f32 %v543_v57, 0.0001 }
 0x177   :  { %v279_v61 = vmax.f32 %v545_v58, 0.0001 }
 0x179   :  { %v768_v3 = vmin.f32 %v279_v61, 0.9999 }
 0x17b   :  { %v302_v12 = vsub.f32 1.0, %v768_v3  ;;  %v330_v58 = vmul.f32 %v768_v3, %v768_v3 }
 0x17d   :  { %v304_v19 = vmul.f32 %v302_v12, %v302_v12 }
 0x183   :  { %105 = vperm.xlu0 %532, %v710_v0  }
 0x187   :  { %533 = vset.pattern.permute.xlu0 %v644_v2  ;;  %v766_v2 = vmin.f32 %v278_v59, 0.9999 }
 0x189   :  { %546 = vlog2.f32 %v766_v2  ;;  %v301_v11 = vsub.f32 1.0, %v766_v2  ;;  %v329_v57 = vmul.f32 %v766_v2, %v766_v2  ;;  %v477_v2 = vsel %vm288_vm9, 1.0, %v646_v6 }
 0x18a   :  { %548 = vlog2.f32 %v768_v3  ;;  %v478_v3 = vsel %vm289_vm10, 1.0, %v646_v6 }
 0x18b   :  { %v303_v18 = vmul.f32 %v301_v11, %v301_v11 }
 0x18c   :  { %v178_v49 = vpop.permute.xlu0 %177  ;;  %v183_v56 = vpop.permute.xlu1 %182 }
 0x18d   :  { %v185_v62 = vadd.f32 %v183_v56, %v731_v21  ;;  %v180_v63 = vmul.f32 %v178_v49, %v175_v22 }
 0x18f   :  { %v186_v4 = vsub.f32 %v185_v62, %v180_v63 }
 0x190   :  { %v197_v60 = vpop.permute.xlu1 %196 }
 0x191   :  { %v199_v1 = vmul.f32 %v197_v60, %v194_v24  ;;  %vm187_vm5 = vcmp.gt.f32.partialorder %v186_v4, 0.0  ;;  %v783_v24 = vsel %vm283_vm7, 1.0, %v646_v6 }
 0x192   :  { %v188_v7 = vsel %vm187_vm5, %v186_v4, 1.0 }
 0x193   :  { %vm200_vm4 = vcmp.gt.f32.partialorder %v199_v1, 0.0  ;;  %v202_v30 = vsub.f32 %v199_v1, %v186_v4 }
 0x194   :  { %v201_v5 = vsel %vm200_vm4, %v199_v1, 1.0 }
 0x195   :  { %550 = vrcp.f32 %v201_v5 }
 0x196   :  { %552 = vrcp.f32 %v188_v7 }
 0x197   :  { %554 = vlog2.f32 %v301_v11 }
 0x198   :  { %556 = vlog2.f32 %v302_v12 }
 0x199   :  { %v374_v52 = vpop.permute.xlu0 %373 }
 0x19a   :  { %vm376_vm3 = vcmp.eq.s32.totalorder %v368_v35, %v374_v52  ;;  %v241_v52 = vld [vmem:[%s831_s7] sm:$0x3] }
 0x19b   :  { %v482_v53 = vsel %vm376_vm3, 1.0, %v646_v6  ;;  %v242_v61 = vsub.f32 %v240_v51, %v241_v52 }
 0x19c   :  { %v402_v54 = vmul.f32 %v482_v53, %v721_v9  ;;  %v414_v55 = vmul.f32 %v483_v41, %v482_v53  ;;  %v547_v9 = vpop.eup %546 }
 0x19d   :  { %v549_v10 = vpop.eup %548  ;;  %v296_v13 = vmul.f32 0.6931472, %v547_v9  ;;  %v100_v22 = vpop.permute.xlu0 %99  ;;  %v243_v7 = vand.u32 2147483647, %v242_v61 }
 0x19e   :  { %405 = vadd.xlane.f32.xlu1 %v402_v54  ;;  %v298_v15 = vmul.f32 0.6931472, %v549_v10  ;;  %v102_v32 = vsub.f32 %v710_v0, %v100_v22 }
 0x19f   :  { %v299_v17 = vmul.f32 0.5, %v296_v13  ;;  %v245_v10 = vsel %vm244_vm12, %v243_v7, 0.0 }
 0x1a0   :  { %v300_v20 = vmul.f32 0.5, %v298_v15  ;;  %v103_v37 = vand.u32 2147483647, %v102_v32 }
 0x1a1   :  { %v305_v21 = vmul.f32 %v303_v18, %v299_v17 }
 0x1a2   :  { %417 = vadd.xlane.f32.xlu1 %v414_v55  ;;  %v306_v25 = vmul.f32 %v304_v19, %v300_v20  ;;  %v551_v27 = vpop.eup %550 }
 0x1a3   :  { %v307_v26 = vmul.f32 %v780_v23, %v305_v21  ;;  %v553_v33 = vpop.eup %552  ;;  %v204_v35 = vmul.f32 %v551_v27, %v202_v30  ;;  %v349_v30 = vadd.f32 %v783_v24, %v780_v23 }
 0x1a4   :  { %v308_v29 = vmul.f32 %v783_v24, %v306_v25  ;;  %v190_v36 = vmul.f32 %v553_v33, %v180_v63  ;;  %v555_v45 = vpop.eup %554 }
 0x1a5   :  { %v557_v46 = vpop.eup %556  ;;  %v324_v48 = vmul.f32 0.6931472, %v555_v45 }
 0x1a6   :  { %v788_v34 = vadd.f32 %v308_v29, %v307_v26  ;;  %v205_v39 = vsub.f32 %v190_v36, %v204_v35  ;;  %v326_v49 = vmul.f32 0.6931472, %v557_v46 }
 0x1a7   :  { %v327_v55 = vmul.f32 0.5, %v324_v48 }
 0x1a8   :  { %v206_v42 = vsub.f32 1.0, %v205_v39  ;;  %v328_v56 = vmul.f32 0.5, %v326_v49 }
 0x1a9   :  { %v331_v1 = vmul.f32 %v329_v57, %v327_v55 }
 0x1aa   :  { %v332_v4 = vmul.f32 %v330_v58, %v328_v56 }
 0x1ab   :  { %v333_v8 = vmul.f32 %v477_v2, %v331_v1 }
 0x1ac   :  { %v334_v9 = vmul.f32 %v478_v3, %v332_v4 }
 0x1ae   :  { %v335_v11 = vadd.f32 %v334_v9, %v333_v8 }
 0x1b3   :  { %207 = vrot.lane.b32.xlu1 %v710_v0, %s650_s0 }
 0x1cb   :  { %v94_v38 = vpop.xlane.xlu1 %93 }
 0x1cc   :  { %vm95_vm8 = vcmp.gt.f32.partialorder %v94_v38, 0.0 }
 0x1cd   :  { %v472_v40 = vsel %vm95_vm8, 1.0, %v646_v6 }
 0x1ce   :  { %v121_v41 = vmul.f32 %v472_v40, %v103_v37  ;;  %v223_v43 = vmul.f32 %v472_v40, %v206_v42 }
 0x1d0   :  { %123 = vrot.lane.b32.xlu1 %v121_v41, %s651_s12 }
 0x1d4   :  { %225 = vrot.lane.b32.xlu1 %v223_v43, %s651_s12 }
 0x1e9   :  { %v394_v12 = vpop.xlane.xlu1 %393 }
 0x1ee   :  { %v392_v0 = vpop.xlane.xlu0 %391 }
 0x1ef   :  { %558 = vlog2.f32 %v392_v0 }
 0x1f0   :  { %560 = vlog2.f32 %v394_v12 }
 0x1f2   :  { %v404_v44 = vpop.xlane.xlu0 %403 }
 0x1f6   :  { %v791_v47 = vpop.xlane.xlu0 %415 }
 0x1f7   :  { %v441_v35 = vsel %vm138_vm11, %v791_v47, 0.0 }
 0x1fc   :  { %v559_v50 = vpop.eup %558 }
 0x1fd   :  { %v396_v53 = vmul.f32 0.6931472, %v559_v50  ;;  %v561_v6 = vpop.eup %560 }
 0x1fe   :  { %v106_v54 = vpop.permute.xlu0 %105  ;;  %v398_v18 = vmul.f32 0.6931472, %v561_v6 }
 0x1ff   :  { %v399_v59 = vadd.f32 %v396_v53, %v749_v31  ;;  %v108_v60 = vmul.f32 %v106_v54, %v103_v37  ;;  %v139_v31 = vsel %vm138_vm11, %v472_v40, 0.0 }
 0x200   :  { %v400_v19 = vadd.f32 %v398_v18, %v745_v28 }
 0x201   :  { %v420_v62 = vsub.f32 %v399_v59, %v404_v44  ;;  %v109_v63 = vsel %vm91_vm1, %v108_v60, 0.0 }
 0x202   :  { %110 = vadd.xlane.f32.xlu1 %v109_v63 }
 0x203   :  { %v422_v5 = vmul.f32 %v420_v62, %v791_v47 }
 0x205   :  { %v425_v32 = vsel %vm138_vm11, %v422_v5, 0.0 }
 0x206   :  { %140 = vadd.xlane.f32.xlu1 %v139_v31 }
 0x20a   :  { %246 = vadd.xlane.f32.xlu1 %v245_v10 }
 0x20e   :  { %336 = vadd.xlane.f32.xlu1 %v335_v11 }
 0x227   :  { %v406_v13 = vpop.xlane.xlu1 %405 }
 0x228   :  { %v421_v20 = vsub.f32 %v400_v19, %v406_v13 }
 0x22b   :  { %v418_v14 = vpop.xlane.xlu1 %417 }
 0x22c   :  { %v423_v22 = vmul.f32 %v421_v20, %v418_v14  ;;  %v442_v33 = vsel %vm138_vm11, %v418_v14, 0.0 }
 0x22d   :  { %v443_v36 = vadd.f32 %v442_v33, %v441_v35 }
 0x22e   :  { %v426_v29 = vsel %vm138_vm11, %v423_v22, 0.0 }
 0x22f   :  { %v208_v15 = vpop.permute.xlu1 %207  ;;  %v427_v28 = vadd.f32 %v426_v29, %v425_v32 }
 0x230   :  { %v210_v16 = vmul.f32 %v208_v15, %v206_v42 }
 0x232   :  { %v211_v17 = vsel %vm138_vm11, %v210_v16, 0.0 }
 0x233   :  { %212 = vadd.xlane.f32.xlu1 %v211_v17 }
 0x242   :  { %v124_v21 = vpop.permute.xlu1 %123 }
 0x243   :  { %v126_v25 = vsel %vm91_vm1, %v124_v21, 0.0 }
 0x244   :  { %127 = vadd.xlane.f32.xlu0 %v126_v25 }
 0x246   :  { %v226_v26 = vpop.permute.xlu1 %225 }
 0x247   :  { %v228_v27 = vsel %vm138_vm11, %v226_v26, 0.0 }
 0x248   :  { %310 = vadd.xlane.f32.xlu0 %v788_v34  ;;  %229 = vadd.xlane.f32.xlu1 %v228_v27 }
 0x24c   :  { %350 = vadd.xlane.f32.xlu0 %v349_v30  ;;  %428 = vadd.xlane.f32.xlu1 %v427_v28 }
 0x250   :  { %444 = vadd.xlane.f32.xlu0 %v443_v36 }
 0x28b   :  { %v111_v37 = vpop.xlane.xlu1 %110 }
 0x28c   :  { %v112_v38 = vrot.slane %v111_v37, 4 }
 0x28e   :  { %v113_v39 = vadd.f32 %v112_v38, %v111_v37 }
 0x28f   :  { %v141_v23 = vpop.xlane.xlu1 %140 }
 0x290   :  { %v114_v34 = vrot.slane %v113_v39, 2  ;;  %v142_v44 = vrot.slane %v141_v23, 4 }
 0x292   :  { %v115_v40 = vadd.f32 %v114_v34, %v113_v39  ;;  %v143_v46 = vadd.f32 %v142_v44, %v141_v23 }
 0x293   :  { %v247_v24 = vpop.xlane.xlu1 %246 }
 0x294   :  { %v116_v41 = vrot.slane %v115_v40, 1  ;;  %v248_v48 = vrot.slane %v247_v24, 4  ;;  %v144_v50 = vrot.slane %v143_v46, 2 }
 0x296   :  { %v117_v42 = vadd.f32 %v116_v41, %v115_v40  ;;  %v249_v51 = vadd.f32 %v248_v48, %v247_v24  ;;  %v145_v60 = vadd.f32 %v144_v50, %v143_v46 }
 0x297   :  { %v337_v43 = vpop.xlane.xlu1 %336 }
 0x298   :  { %490 = vpush %v117_v42  ;;  %v338_v47 = vrot.slane %v337_v43, 4  ;;  %v250_v57 = vrot.slane %v249_v51, 2  ;;  %v146_v8 = vrot.slane %v145_v60, 1 }
 0x29a   :  { %v339_v54 = vadd.f32 %v338_v47, %v337_v43  ;;  %v251_v9 = vadd.f32 %v250_v57, %v249_v51  ;;  %v147_v22 = vadd.f32 %v146_v8, %v145_v60 }
 0x29c   :  { %v340_v1 = vrot.slane %v339_v54, 2  ;;  %v252_v25 = vrot.slane %v251_v9, 1 }
 0x29e   :  { %v341_v16 = vadd.f32 %v340_v1, %v339_v54  ;;  %v253_v39 = vadd.f32 %v252_v25, %v251_v9 }
 0x2a0   :  { %v342_v33 = vrot.slane %v341_v16, 1 }
 0x2a2   :  { %v343_v23 = vadd.f32 %v342_v33, %v341_v16 }
 0x2bc   :  { %v213_v0 = vpop.xlane.xlu1 %212 }
 0x2bd   :  { %v214_v45 = vrot.slane %v213_v0, 4 }
 0x2bf   :  { %v215_v49 = vadd.f32 %v214_v45, %v213_v0 }
 0x2c1   :  { %v216_v55 = vrot.slane %v215_v49, 2 }
 0x2c3   :  { %v217_v4 = vadd.f32 %v216_v55, %v215_v49 }
 0x2c5   :  { %v218_v15 = vrot.slane %v217_v4, 1 }
 0x2c7   :  { %v219_v32 = vadd.f32 %v218_v15, %v217_v4 }
 0x2c9   :  { %s491_s6 = spop %490 }
 0x2ca   :  { %120 = sst [smem:[#allocation8 + $0x5]] %s491_s6 }
 0x2cd   :  { %v128_v52 = vpop.xlane.xlu0 %127 }
 0x2ce   :  { %v129_v53 = vrot.slane %v128_v52, 4 }
 0x2d0   :  { %v130_v56 = vadd.f32 %v129_v53, %v128_v52 }
 0x2d1   :  { %v230_v58 = vpop.xlane.xlu1 %229  ;;  %v311_v59 = vpop.xlane.xlu0 %310 }
 0x2d2   :  { %v131_v61 = vrot.slane %v130_v56, 2  ;;  %v231_v62 = vrot.slane %v230_v58, 4  ;;  %v312_v63 = vrot.slane %v311_v59, 4 }
 0x2d4   :  { %v232_v5 = vadd.f32 %v231_v62, %v230_v58  ;;  %v313_v7 = vadd.f32 %v312_v63, %v311_v59  ;;  %v132_v2 = vadd.f32 %v131_v61, %v130_v56 }
 0x2d5   :  { %v429_v3 = vpop.xlane.xlu1 %428  ;;  %v351_v31 = vpop.xlane.xlu0 %350 }
 0x2d6   :  { %v233_v10 = vrot.slane %v232_v5, 2  ;;  %v314_v11 = vrot.slane %v313_v7, 2  ;;  %v430_v12 = vrot.slane %v429_v3, 4  ;;  %v352_v13 = vrot.slane %v351_v31, 4 }
 0x2d7   :  { %v133_v14 = vrot.slane %v132_v2, 1 }
 0x2d8   :  { %v431_v17 = vadd.f32 %v430_v12, %v429_v3  ;;  %v353_v6 = vadd.f32 %v352_v13, %v351_v31  ;;  %v234_v18 = vadd.f32 %v233_v10, %v232_v5  ;;  %v315_v19 = vadd.f32 %v314_v11, %v313_v7 }
 0x2d9   :  { %v445_v20 = vpop.xlane.xlu0 %444  ;;  %v134_v21 = vadd.f32 %v133_v14, %v132_v2 }
 0x2da   :  { %v432_v26 = vrot.slane %v431_v17, 2  ;;  %v354_v27 = vrot.slane %v353_v6, 2  ;;  %v446_v29 = vrot.slane %v445_v20, 4  ;;  %v235_v30 = vrot.slane %v234_v18, 1 }
 0x2db   :  { %492 = vpush %v134_v21  ;;  %v316_v28 = vrot.slane %v315_v19, 1 }
 0x2dc   :  { %v433_v35 = vadd.f32 %v432_v26, %v431_v17  ;;  %v447_v36 = vadd.f32 %v446_v29, %v445_v20  ;;  %494 = vpush %v147_v22  ;;  %v236_v37 = vadd.f32 %v235_v30, %v234_v18  ;;  %v355_v38 = vadd.f32 %v354_v27, %v353_v6 }
 0x2dd   :  { %496 = vpush %v219_v32  ;;  %v317_v34 = vadd.f32 %v316_v28, %v315_v19 }
 0x2de   :  { %v448_v40 = vrot.slane %v447_v36, 2  ;;  %498 = vpush %v236_v37  ;;  %v356_v41 = vrot.slane %v355_v38, 1  ;;  %v434_v42 = vrot.slane %v433_v35, 1 }
 0x2df   :  { %500 = vpush %v253_v39 }
 0x2e0   :  { %v449_v24 = vadd.f32 %v448_v40, %v447_v36  ;;  %502 = vpush %v317_v34  ;;  %v357_v43 = vadd.f32 %v356_v41, %v355_v38  ;;  %v435_v0 = vadd.f32 %v434_v42, %v433_v35 }
 0x2e1   :  { %504 = vpush %v343_v23 }
 0x2e2   :  { %506 = vpush %v357_v43  ;;  %v450_v44 = vrot.slane %v449_v24, 1 }
 0x2e3   :  { %508 = vpush %v435_v0 }
 0x2e4   :  { %v451_v45 = vadd.f32 %v450_v44, %v449_v24 }
 0x2e6   :  { %510 = vpush %v451_v45 }
 0x30c   :  { %s493_s7 = spop %492 }
 0x30d   :  { %137 = sst [smem:[#allocation8 + $0x6]] %s493_s7  ;;  %s495_s17 = spop %494 }
 0x30e   :  { %150 = sst [smem:[#allocation8 + $0x7]] %s495_s17  ;;  %s497_s18 = spop %496 }
 0x30f   :  { %222 = sst [smem:[#allocation8 + $0x8]] %s497_s18  ;;  %s499_s19 = spop %498 }
 0x310   :  { %239 = sst [smem:[#allocation8 + $0x9]] %s499_s19  ;;  %s501_s20 = spop %500 }
 0x311   :  { %s257_s2 = smul.f32 0.015625, %s501_s20  ;;  %s503_s21 = spop %502 }
 0x312   :  { %s505_s22 = spop %504  ;;  %321 = sst [smem:[#allocation8]] %s503_s21 }
 0x313   :  { %259 = sst [smem:[#allocation8 + $0xa]] %s257_s2  ;;  %s507_s23 = spop %506 }
 0x314   :  { %s509_s1 = spop %508  ;;  %347 = sst [smem:[#allocation8 + $0x1]] %s505_s22 }
 0x315   :  { %361 = sst [smem:[#allocation8 + $0x2]] %s507_s23 }
 0x316   :  { %439 = sst [smem:[#allocation8 + $0x3]] %s509_s1 }
 0x317   :  { %s511_s24 = spop %510 }
 0x318   :  { %455 = sst [smem:[#allocation8 + $0x4]] %s511_s24 }
 0x319   :  { %463 = dma.smem_to_hbm %s652_s25, 16, %s832_s8, [#allocation4]  }
 0x31a   :  { %634 = dma.done.wait [#allocation4], 16  }
 0x31b   :  { %635 = vsyncadd [#allocation4], 4294967280 }
 0x31c   :  { %467 = sfence }
 0x31d   :  { %468 = vsyncpa [#allocation3], 1 }
 0x31e   :  { %469 = vsyncpa [#allocation6], 1 }
 0x31f   :  { %470 = vsyncpa [#allocation4], 1 }

</bundles_post_ra>
